<compile_context>
chip_gen: v7x
topology: tpu7x:2x2x1
jax: 0.10.0
libtpu: 0.0.40
codegen_flags: <defaults>
</compile_context>

<pallas_src>
import jax
import jax.numpy as jnp
from jax import lax
from jax.experimental import pallas as pl
from jax.experimental.pallas import tpu as pltpu


def gru_decoder_kernel(x_ref, h0_ref,
                       wihT_ref, whhT_ref,
                       b_gi_ref, b_hn_ref,
                       wfcT_ref, bfc_ref,
                       logits_ref, hfin_ref):
    """GRU recurrence over time + output projection, all in VMEM.

    x_ref:      (S*B, E)   time-major flattened embedded tokens
    h0_ref:     (B, H)     initial hidden state
    wihT_ref:   (E, 3H)    fused input->gate weight, columns ordered [r|z|n]
    whhT_ref:   (H, 3H)    fused hidden->gate weight, columns ordered [r|z|n]
    b_gi_ref:   (1, 3H)    fused gi bias [b_ih_r+b_hh_r | b_ih_z+b_hh_z | b_in]
    b_hn_ref:   (1, H)     hidden n-gate bias (must stay inside r * (...))
    wfcT_ref:   (H, Vp)    fc weight (transposed, vocab zero-padded to 128 lanes)
    bfc_ref:    (1, Vp)
    logits_ref: (S*B, Vp)  output logits (lane-dense, padded vocab)
    hfin_ref:   (B, H)     final hidden state
    """
    SB, _ = x_ref.shape
    B, H = h0_ref.shape
    S = SB // B
    H2 = 2 * H

    # Hoisted fused input->gates projection for ALL steps at once, with the
    # foldable biases added off the sequential critical path: (S*B, 3H).
    gi_all = jnp.dot(x_ref[...], wihT_ref[...],
                     preferred_element_type=jnp.float32) + b_gi_ref[...]

    whh = whhT_ref[...]                                   # (H, 3H), one weight
    # Hoist the b_hn broadcast once (JAX does not CSE broadcast_in_dim).
    b_hn = jnp.broadcast_to(b_hn_ref[...], (B, H))

    # Fully-unrolled time loop (S is small and static): a single (B,H)@(H,3H)
    # MXU push per step, one fused r/z sigmoid and one tanh on the EUP.
    # TODO(synk): hold whh in MXU weight registers across the loop via
    # pltpu.matmul_push_rhs / matmul_acc_lhs / matmul_pop to drop the per-step
    # weight re-push from the serial chain (and use the v7x MRB to accumulate
    # gi + gh in-place).
    h = h0_ref[...]
    h_steps = []
    for t in range(S):
        lo = t * B
        gi = gi_all[lo:lo + B, :]                                    # (B, 3H)
        gh = jnp.dot(h, whh, preferred_element_type=jnp.float32)     # (B, 3H)
        # Fused r/z sigmoid over one contiguous 2H-lane block (single EUP op).
        rz = jax.nn.sigmoid(gi[:, :H2] + gh[:, :H2])
        r = rz[:, :H]
        z = rz[:, H:]
        n = jnp.tanh(gi[:, H2:] + r * (gh[:, H2:] + b_hn))
        h = (1.0 - z) * n + z * h
        h_steps.append(h)

    hfin_ref[...] = h

    # Register-resident per-step hiddens -> one (S*B, H) block -> one FC matmul.
    # Vp is a multiple of 128 -> unmasked, lane-dense stores.
    h_all = jnp.concatenate(h_steps, axis=0)                         # (S*B, H)
    logits = jnp.dot(h_all, wfcT_ref[...], preferred_element_type=jnp.float32)
    logits_ref[...] = logits + bfc_ref[...]


def prepare_kernel_params(params):
    """One-time (outside jit) weight re-layout: transpose, fuse per-gate blocks,
    fold biases, and zero-pad the fc vocab dim to a 128-lane boundary."""
    w_ih = params["w_ih"]                      # (3H, E), rows stacked [r; z; n]
    w_hh = params["w_hh"]                      # (3H, H)
    b_ih = params["b_ih"]                      # (3H,)
    b_hh = params["b_hh"]                      # (3H,)
    w_fc = params["w_fc"]                      # (V, H)
    b_fc = params["b_fc"]                      # (V,)
    H = w_hh.shape[1]
    V = w_fc.shape[0]
    Vp = ((V + 127) // 128) * 128

    # Fused, transposed gate weights: columns already ordered [r|z|n].
    wihT = jnp.transpose(w_ih).astype(jnp.float32)        # (E, 3H)
    whhT = jnp.transpose(w_hh).astype(jnp.float32)        # (H, 3H)

    # Fused gi bias row: r and z get b_ih+b_hh folded; n only gets b_in
    # (b_hn must stay inside r * (Wh h + b_hn)).
    b_gi = jnp.concatenate([
        b_ih[0 * H:1 * H] + b_hh[0 * H:1 * H],
        b_ih[1 * H:2 * H] + b_hh[1 * H:2 * H],
        b_ih[2 * H:3 * H],
    ])[None, :].astype(jnp.float32)                       # (1, 3H)
    b_hn = b_hh[2 * H:3 * H][None, :].astype(jnp.float32)  # (1, H)

    wfcT_pad = jnp.zeros((H, Vp), jnp.float32).at[:, :V].set(jnp.transpose(w_fc))
    bfc_pad = jnp.zeros((1, Vp), jnp.float32).at[:, :V].set(b_fc[None, :])

    return {
        "emb": params["embedding"],            # (V, E)
        "wihT": wihT,                          # (E, 3H)
        "whhT": whhT,                          # (H, 3H)
        "b_gi": b_gi,                          # (1, 3H)
        "b_hn": b_hn,                          # (1, H)
        "wfcT": wfcT_pad,                      # (H, Vp)
        "bfc": bfc_pad,                        # (1, Vp)
    }


@jax.jit
def decoder_forward(token_seq, hidden_state, kparams):
    """Mirror of Decoder.forward(token_seq, hidden_state)."""
    emb_table = kparams["emb"]                 # (V, E)
    V, E = emb_table.shape
    B, S = token_seq.shape
    H = hidden_state.shape[1]
    Vp = kparams["wfcT"].shape[1]

    # Embedding lookup (glue), gathered directly in time-major flat order:
    # row t*B + b corresponds to (step t, batch b).  No XLA transpose kernel.
    # TODO(synk): the gather could be fused into the kernel via
    # PrefetchScalarGridSpec + pl.Element row-gather once V/E/S scale up.
    flat_ids = jnp.reshape(jnp.transpose(token_seq), (-1,))          # (S*B,)
    x_flat = jnp.take(emb_table, flat_ids, axis=0)                   # (S*B, E)

    vmem = pl.BlockSpec(memory_space=pltpu.MemorySpace.VMEM)

    logits_pad, h_final = pl.pallas_call(
        gru_decoder_kernel,
        out_shape=(
            jax.ShapeDtypeStruct((S * B, Vp), jnp.float32),
            jax.ShapeDtypeStruct((B, H), jnp.float32),
        ),
        in_specs=[vmem] * 8,
        out_specs=(vmem, vmem),
    )(
        x_flat,
        hidden_state,
        kparams["wihT"], kparams["whhT"],
        kparams["b_gi"], kparams["b_hn"],
        kparams["wfcT"], kparams["bfc"],
    )

    logits = logits_pad[:, :V].reshape(S, B, V)                      # (S, B, V)
    logits = jnp.transpose(logits, (1, 0, 2))                        # (B, S, V)
    hidden = h_final[None, :, :]                                     # (1, B, H)
    return logits, hidden


def reference_forward(token_seq, hidden_state, params):
    """Pure-JAX reference reproducing PyTorch GRU semantics, for verification."""
    emb = jnp.take(params["embedding"], token_seq, axis=0)           # (B, S, E)
    H = hidden_state.shape[1]
    w_ih, w_hh = params["w_ih"], params["w_hh"]
    b_ih, b_hh = params["b_ih"], params["b_hh"]

    def step(h, x_t):
        gi = x_t @ w_ih.T + b_ih
        gh = h @ w_hh.T + b_hh
        r = jax.nn.sigmoid(gi[:, :H] + gh[:, :H])
        z = jax.nn.sigmoid(gi[:, H:2 * H] + gh[:, H:2 * H])
        n = jnp.tanh(gi[:, 2 * H:] + r * gh[:, 2 * H:])
        h_new = (1.0 - z) * n + z * h
        return h_new, h_new

    h_last, hs = lax.scan(step, hidden_state, jnp.transpose(emb, (1, 0, 2)))
    outputs = jnp.transpose(hs, (1, 0, 2))                           # (B, S, H)
    logits = outputs @ params["w_fc"].T + params["b_fc"]
    return logits, h_last[None]


def init_params(key, input_dim, emb_dim, hidden_dim):
    H = hidden_dim * 2
    ks = jax.random.split(key, 7)
    s = 1.0 / jnp.sqrt(H)
    return {
        "embedding": jax.random.normal(ks[0], (input_dim, emb_dim), jnp.float32),
        "w_ih": jax.random.uniform(ks[1], (3 * H, emb_dim), jnp.float32, -s, s),
        "w_hh": jax.random.uniform(ks[2], (3 * H, H), jnp.float32, -s, s),
        "b_ih": jax.random.uniform(ks[3], (3 * H,), jnp.float32, -s, s),
        "b_hh": jax.random.uniform(ks[4], (3 * H,), jnp.float32, -s, s),
        "w_fc": jax.random.uniform(ks[5], (input_dim, H), jnp.float32, -s, s),
        "b_fc": jax.random.uniform(ks[6], (input_dim,), jnp.float32, -s, s),
    }


if __name__ == "__main__":
    # Module hyper-params (small, consistent with the forward pass).
    input_dim = 64     # vocab size
    emb_dim = 32
    hidden_dim = 16    # GRU hidden = hidden_dim * 2 = 32
    # dropout is ignored: nn.GRU with num_layers=1 does not apply dropout.

    batch, seq = 2, 8
    H = hidden_dim * 2

    key = jax.random.PRNGKey(0)
    k_tok, k_hid, k_par = jax.random.split(key, 3)

    token_seq = jax.random.randint(k_tok, (batch, seq), 0, input_dim, jnp.int32)
    hidden_state = jax.random.normal(k_hid, (batch, H), jnp.float32)
    params = init_params(k_par, input_dim, emb_dim, hidden_dim)

    # One-time weight re-layout outside the jitted forward.
    kparams = prepare_kernel_params(params)

    logits, hidden = decoder_forward(token_seq, hidden_state, kparams)
    jax.block_until_ready((logits, hidden))

    ref_logits, ref_hidden = reference_forward(token_seq, hidden_state, params)
    assert logits.shape == (batch, seq, input_dim)
    assert hidden.shape == (1, batch, H)
    assert jnp.allclose(logits, ref_logits, atol=1e-5, rtol=1e-5)
    assert jnp.allclose(hidden, ref_hidden, atol=1e-5, rtol=1e-5)

    print("KERNEL_OK")
</pallas_src>

<mosaic_0001>
module attributes {stable_mosaic.version = 11 : i64} {
  func.func @gru_decoder_kernel(%arg0: memref<16x32xf32, #tpu.memory_space<vmem>>, %arg1: memref<2x32xf32, #tpu.memory_space<vmem>>, %arg2: memref<32x96xf32, #tpu.memory_space<vmem>>, %arg3: memref<32x96xf32, #tpu.memory_space<vmem>>, %arg4: memref<1x96xf32, #tpu.memory_space<vmem>>, %arg5: memref<1x32xf32, #tpu.memory_space<vmem>>, %arg6: memref<32x128xf32, #tpu.memory_space<vmem>>, %arg7: memref<1x128xf32, #tpu.memory_space<vmem>>, %arg8: memref<16x128xf32, #tpu.memory_space<vmem>>, %arg9: memref<2x32xf32, #tpu.memory_space<vmem>>) attributes {dimension_semantics = [], scalar_prefetch = 0 : i64, scratch_operands = 0 : i64, tpu.core_type = #tpu.core_type<tc>} {
    %c0 = arith.constant 0 : index
    %c0_0 = arith.constant 0 : index
    %0 = vector.load %arg0[%c0, %c0_0] : memref<16x32xf32, #tpu.memory_space<vmem>>, vector<16x32xf32>
    %c0_1 = arith.constant 0 : index
    %c0_2 = arith.constant 0 : index
    %1 = vector.load %arg2[%c0_1, %c0_2] : memref<32x96xf32, #tpu.memory_space<vmem>>, vector<32x96xf32>
    %cst = arith.constant dense<0.000000e+00> : vector<16x96xf32>
    %2 = tpu.matmul %0, %1, %cst {dimension_numbers = #tpu.dot_dimension_numbers<[1], [0], [0], [1], [0, 0, 1, 1], [], []>} : vector<16x32xf32>, vector<32x96xf32>, vector<16x96xf32> -> vector<16x96xf32>
    %c0_3 = arith.constant 0 : index
    %c0_4 = arith.constant 0 : index
    %3 = vector.load %arg4[%c0_3, %c0_4] : memref<1x96xf32, #tpu.memory_space<vmem>>, vector<1x96xf32>
    %4 = vector.broadcast %3 : vector<1x96xf32> to vector<16x96xf32>
    %5 = arith.addf %2, %4 : vector<16x96xf32>
    %c0_5 = arith.constant 0 : index
    %c0_6 = arith.constant 0 : index
    %6 = vector.load %arg3[%c0_5, %c0_6] : memref<32x96xf32, #tpu.memory_space<vmem>>, vector<32x96xf32>
    %c0_7 = arith.constant 0 : index
    %c0_8 = arith.constant 0 : index
    %7 = vector.load %arg5[%c0_7, %c0_8] : memref<1x32xf32, #tpu.memory_space<vmem>>, vector<1x32xf32>
    %8 = vector.shape_cast %7 : vector<1x32xf32> to vector<1x32xf32>
    %9 = vector.broadcast %8 : vector<1x32xf32> to vector<2x32xf32>
    %c0_9 = arith.constant 0 : index
    %c0_10 = arith.constant 0 : index
    %10 = vector.load %arg1[%c0_9, %c0_10] : memref<2x32xf32, #tpu.memory_space<vmem>>, vector<2x32xf32>
    %11 = vector.extract_strided_slice %5 {offsets = [0, 0], sizes = [2, 96], strides = [1, 1]} : vector<16x96xf32> to vector<2x96xf32>
    %cst_11 = arith.constant dense<0.000000e+00> : vector<2x96xf32>
    %12 = tpu.matmul %10, %6, %cst_11 {dimension_numbers = #tpu.dot_dimension_numbers<[1], [0], [0], [1], [0, 0, 1, 1], [], []>} : vector<2x32xf32>, vector<32x96xf32>, vector<2x96xf32> -> vector<2x96xf32>
    %13 = vector.extract_strided_slice %11 {offsets = [0, 0], sizes = [2, 64], strides = [1, 1]} : vector<2x96xf32> to vector<2x64xf32>
    %14 = vector.extract_strided_slice %12 {offsets = [0, 0], sizes = [2, 64], strides = [1, 1]} : vector<2x96xf32> to vector<2x64xf32>
    %15 = arith.addf %13, %14 : vector<2x64xf32>
    %16 = arith.negf %15 : vector<2x64xf32>
    %17 = math.exp %16 : vector<2x64xf32>
    %cst_12 = arith.constant 1.000000e+00 : f32
    %18 = vector.broadcast %cst_12 : f32 to vector<2x64xf32>
    %19 = arith.addf %18, %17 : vector<2x64xf32>
    %20 = arith.divf %18, %19 : vector<2x64xf32>
    %21 = vector.extract_strided_slice %20 {offsets = [0, 0], sizes = [2, 32], strides = [1, 1]} : vector<2x64xf32> to vector<2x32xf32>
    %22 = vector.extract_strided_slice %20 {offsets = [0, 32], sizes = [2, 32], strides = [1, 1]} : vector<2x64xf32> to vector<2x32xf32>
    %23 = vector.extract_strided_slice %11 {offsets = [0, 64], sizes = [2, 32], strides = [1, 1]} : vector<2x96xf32> to vector<2x32xf32>
    %24 = vector.extract_strided_slice %12 {offsets = [0, 64], sizes = [2, 32], strides = [1, 1]} : vector<2x96xf32> to vector<2x32xf32>
    %25 = arith.addf %24, %9 : vector<2x32xf32>
    %26 = arith.mulf %21, %25 : vector<2x32xf32>
    %27 = arith.addf %23, %26 : vector<2x32xf32>
    %28 = math.tanh %27 : vector<2x32xf32>
    %cst_13 = arith.constant 1.000000e+00 : f32
    %29 = vector.broadcast %cst_13 : f32 to vector<2x32xf32>
    %30 = arith.subf %29, %22 : vector<2x32xf32>
    %31 = arith.mulf %30, %28 : vector<2x32xf32>
    %32 = arith.mulf %22, %10 : vector<2x32xf32>
    %33 = arith.addf %31, %32 : vector<2x32xf32>
    %34 = vector.extract_strided_slice %5 {offsets = [2, 0], sizes = [2, 96], strides = [1, 1]} : vector<16x96xf32> to vector<2x96xf32>
    %cst_14 = arith.constant dense<0.000000e+00> : vector<2x96xf32>
    %35 = tpu.matmul %33, %6, %cst_14 {dimension_numbers = #tpu.dot_dimension_numbers<[1], [0], [0], [1], [0, 0, 1, 1], [], []>} : vector<2x32xf32>, vector<32x96xf32>, vector<2x96xf32> -> vector<2x96xf32>
    %36 = vector.extract_strided_slice %34 {offsets = [0, 0], sizes = [2, 64], strides = [1, 1]} : vector<2x96xf32> to vector<2x64xf32>
    %37 = vector.extract_strided_slice %35 {offsets = [0, 0], sizes = [2, 64], strides = [1, 1]} : vector<2x96xf32> to vector<2x64xf32>
    %38 = arith.addf %36, %37 : vector<2x64xf32>
    %39 = arith.negf %38 : vector<2x64xf32>
    %40 = math.exp %39 : vector<2x64xf32>
    %cst_15 = arith.constant 1.000000e+00 : f32
    %41 = vector.broadcast %cst_15 : f32 to vector<2x64xf32>
    %42 = arith.addf %41, %40 : vector<2x64xf32>
    %43 = arith.divf %41, %42 : vector<2x64xf32>
    %44 = vector.extract_strided_slice %43 {offsets = [0, 0], sizes = [2, 32], strides = [1, 1]} : vector<2x64xf32> to vector<2x32xf32>
    %45 = vector.extract_strided_slice %43 {offsets = [0, 32], sizes = [2, 32], strides = [1, 1]} : vector<2x64xf32> to vector<2x32xf32>
    %46 = vector.extract_strided_slice %34 {offsets = [0, 64], sizes = [2, 32], strides = [1, 1]} : vector<2x96xf32> to vector<2x32xf32>
    %47 = vector.extract_strided_slice %35 {offsets = [0, 64], sizes = [2, 32], strides = [1, 1]} : vector<2x96xf32> to vector<2x32xf32>
    %48 = arith.addf %47, %9 : vector<2x32xf32>
    %49 = arith.mulf %44, %48 : vector<2x32xf32>
    %50 = arith.addf %46, %49 : vector<2x32xf32>
    %51 = math.tanh %50 : vector<2x32xf32>
    %cst_16 = arith.constant 1.000000e+00 : f32
    %52 = vector.broadcast %cst_16 : f32 to vector<2x32xf32>
    %53 = arith.subf %52, %45 : vector<2x32xf32>
    %54 = arith.mulf %53, %51 : vector<2x32xf32>
    %55 = arith.mulf %45, %33 : vector<2x32xf32>
    %56 = arith.addf %54, %55 : vector<2x32xf32>
    %57 = vector.extract_strided_slice %5 {offsets = [4, 0], sizes = [2, 96], strides = [1, 1]} : vector<16x96xf32> to vector<2x96xf32>
    %cst_17 = arith.constant dense<0.000000e+00> : vector<2x96xf32>
    %58 = tpu.matmul %56, %6, %cst_17 {dimension_numbers = #tpu.dot_dimension_numbers<[1], [0], [0], [1], [0, 0, 1, 1], [], []>} : vector<2x32xf32>, vector<32x96xf32>, vector<2x96xf32> -> vector<2x96xf32>
    %59 = vector.extract_strided_slice %57 {offsets = [0, 0], sizes = [2, 64], strides = [1, 1]} : vector<2x96xf32> to vector<2x64xf32>
    %60 = vector.extract_strided_slice %58 {offsets = [0, 0], sizes = [2, 64], strides = [1, 1]} : vector<2x96xf32> to vector<2x64xf32>
    %61 = arith.addf %59, %60 : vector<2x64xf32>
    %62 = arith.negf %61 : vector<2x64xf32>
    %63 = math.exp %62 : vector<2x64xf32>
    %cst_18 = arith.constant 1.000000e+00 : f32
    %64 = vector.broadcast %cst_18 : f32 to vector<2x64xf32>
    %65 = arith.addf %64, %63 : vector<2x64xf32>
    %66 = arith.divf %64, %65 : vector<2x64xf32>
    %67 = vector.extract_strided_slice %66 {offsets = [0, 0], sizes = [2, 32], strides = [1, 1]} : vector<2x64xf32> to vector<2x32xf32>
    %68 = vector.extract_strided_slice %66 {offsets = [0, 32], sizes = [2, 32], strides = [1, 1]} : vector<2x64xf32> to vector<2x32xf32>
    %69 = vector.extract_strided_slice %57 {offsets = [0, 64], sizes = [2, 32], strides = [1, 1]} : vector<2x96xf32> to vector<2x32xf32>
    %70 = vector.extract_strided_slice %58 {offsets = [0, 64], sizes = [2, 32], strides = [1, 1]} : vector<2x96xf32> to vector<2x32xf32>
    %71 = arith.addf %70, %9 : vector<2x32xf32>
    %72 = arith.mulf %67, %71 : vector<2x32xf32>
    %73 = arith.addf %69, %72 : vector<2x32xf32>
    %74 = math.tanh %73 : vector<2x32xf32>
    %cst_19 = arith.constant 1.000000e+00 : f32
    %75 = vector.broadcast %cst_19 : f32 to vector<2x32xf32>
    %76 = arith.subf %75, %68 : vector<2x32xf32>
    %77 = arith.mulf %76, %74 : vector<2x32xf32>
    %78 = arith.mulf %68, %56 : vector<2x32xf32>
    %79 = arith.addf %77, %78 : vector<2x32xf32>
    %80 = vector.extract_strided_slice %5 {offsets = [6, 0], sizes = [2, 96], strides = [1, 1]} : vector<16x96xf32> to vector<2x96xf32>
    %cst_20 = arith.constant dense<0.000000e+00> : vector<2x96xf32>
    %81 = tpu.matmul %79, %6, %cst_20 {dimension_numbers = #tpu.dot_dimension_numbers<[1], [0], [0], [1], [0, 0, 1, 1], [], []>} : vector<2x32xf32>, vector<32x96xf32>, vector<2x96xf32> -> vector<2x96xf32>
    %82 = vector.extract_strided_slice %80 {offsets = [0, 0], sizes = [2, 64], strides = [1, 1]} : vector<2x96xf32> to vector<2x64xf32>
    %83 = vector.extract_strided_slice %81 {offsets = [0, 0], sizes = [2, 64], strides = [1, 1]} : vector<2x96xf32> to vector<2x64xf32>
    %84 = arith.addf %82, %83 : vector<2x64xf32>
    %85 = arith.negf %84 : vector<2x64xf32>
    %86 = math.exp %85 : vector<2x64xf32>
    %cst_21 = arith.constant 1.000000e+00 : f32
    %87 = vector.broadcast %cst_21 : f32 to vector<2x64xf32>
    %88 = arith.addf %87, %86 : vector<2x64xf32>
    %89 = arith.divf %87, %88 : vector<2x64xf32>
    %90 = vector.extract_strided_slice %89 {offsets = [0, 0], sizes = [2, 32], strides = [1, 1]} : vector<2x64xf32> to vector<2x32xf32>
    %91 = vector.extract_strided_slice %89 {offsets = [0, 32], sizes = [2, 32], strides = [1, 1]} : vector<2x64xf32> to vector<2x32xf32>
    %92 = vector.extract_strided_slice %80 {offsets = [0, 64], sizes = [2, 32], strides = [1, 1]} : vector<2x96xf32> to vector<2x32xf32>
    %93 = vector.extract_strided_slice %81 {offsets = [0, 64], sizes = [2, 32], strides = [1, 1]} : vector<2x96xf32> to vector<2x32xf32>
    %94 = arith.addf %93, %9 : vector<2x32xf32>
    %95 = arith.mulf %90, %94 : vector<2x32xf32>
    %96 = arith.addf %92, %95 : vector<2x32xf32>
    %97 = math.tanh %96 : vector<2x32xf32>
    %cst_22 = arith.constant 1.000000e+00 : f32
    %98 = vector.broadcast %cst_22 : f32 to vector<2x32xf32>
    %99 = arith.subf %98, %91 : vector<2x32xf32>
    %100 = arith.mulf %99, %97 : vector<2x32xf32>
    %101 = arith.mulf %91, %79 : vector<2x32xf32>
    %102 = arith.addf %100, %101 : vector<2x32xf32>
    %103 = vector.extract_strided_slice %5 {offsets = [8, 0], sizes = [2, 96], strides = [1, 1]} : vector<16x96xf32> to vector<2x96xf32>
    %cst_23 = arith.constant dense<0.000000e+00> : vector<2x96xf32>
    %104 = tpu.matmul %102, %6, %cst_23 {dimension_numbers = #tpu.dot_dimension_numbers<[1], [0], [0], [1], [0, 0, 1, 1], [], []>} : vector<2x32xf32>, vector<32x96xf32>, vector<2x96xf32> -> vector<2x96xf32>
    %105 = vector.extract_strided_slice %103 {offsets = [0, 0], sizes = [2, 64], strides = [1, 1]} : vector<2x96xf32> to vector<2x64xf32>
    %106 = vector.extract_strided_slice %104 {offsets = [0, 0], sizes = [2, 64], strides = [1, 1]} : vector<2x96xf32> to vector<2x64xf32>
    %107 = arith.addf %105, %106 : vector<2x64xf32>
    %108 = arith.negf %107 : vector<2x64xf32>
    %109 = math.exp %108 : vector<2x64xf32>
    %cst_24 = arith.constant 1.000000e+00 : f32
    %110 = vector.broadcast %cst_24 : f32 to vector<2x64xf32>
    %111 = arith.addf %110, %109 : vector<2x64xf32>
    %112 = arith.divf %110, %111 : vector<2x64xf32>
    %113 = vector.extract_strided_slice %112 {offsets = [0, 0], sizes = [2, 32], strides = [1, 1]} : vector<2x64xf32> to vector<2x32xf32>
    %114 = vector.extract_strided_slice %112 {offsets = [0, 32], sizes = [2, 32], strides = [1, 1]} : vector<2x64xf32> to vector<2x32xf32>
    %115 = vector.extract_strided_slice %103 {offsets = [0, 64], sizes = [2, 32], strides = [1, 1]} : vector<2x96xf32> to vector<2x32xf32>
    %116 = vector.extract_strided_slice %104 {offsets = [0, 64], sizes = [2, 32], strides = [1, 1]} : vector<2x96xf32> to vector<2x32xf32>
    %117 = arith.addf %116, %9 : vector<2x32xf32>
    %118 = arith.mulf %113, %117 : vector<2x32xf32>
    %119 = arith.addf %115, %118 : vector<2x32xf32>
    %120 = math.tanh %119 : vector<2x32xf32>
    %cst_25 = arith.constant 1.000000e+00 : f32
    %121 = vector.broadcast %cst_25 : f32 to vector<2x32xf32>
    %122 = arith.subf %121, %114 : vector<2x32xf32>
    %123 = arith.mulf %122, %120 : vector<2x32xf32>
    %124 = arith.mulf %114, %102 : vector<2x32xf32>
    %125 = arith.addf %123, %124 : vector<2x32xf32>
    %126 = vector.extract_strided_slice %5 {offsets = [10, 0], sizes = [2, 96], strides = [1, 1]} : vector<16x96xf32> to vector<2x96xf32>
    %cst_26 = arith.constant dense<0.000000e+00> : vector<2x96xf32>
    %127 = tpu.matmul %125, %6, %cst_26 {dimension_numbers = #tpu.dot_dimension_numbers<[1], [0], [0], [1], [0, 0, 1, 1], [], []>} : vector<2x32xf32>, vector<32x96xf32>, vector<2x96xf32> -> vector<2x96xf32>
    %128 = vector.extract_strided_slice %126 {offsets = [0, 0], sizes = [2, 64], strides = [1, 1]} : vector<2x96xf32> to vector<2x64xf32>
    %129 = vector.extract_strided_slice %127 {offsets = [0, 0], sizes = [2, 64], strides = [1, 1]} : vector<2x96xf32> to vector<2x64xf32>
    %130 = arith.addf %128, %129 : vector<2x64xf32>
    %131 = arith.negf %130 : vector<2x64xf32>
    %132 = math.exp %131 : vector<2x64xf32>
    %cst_27 = arith.constant 1.000000e+00 : f32
    %133 = vector.broadcast %cst_27 : f32 to vector<2x64xf32>
    %134 = arith.addf %133, %132 : vector<2x64xf32>
    %135 = arith.divf %133, %134 : vector<2x64xf32>
    %136 = vector.extract_strided_slice %135 {offsets = [0, 0], sizes = [2, 32], strides = [1, 1]} : vector<2x64xf32> to vector<2x32xf32>
    %137 = vector.extract_strided_slice %135 {offsets = [0, 32], sizes = [2, 32], strides = [1, 1]} : vector<2x64xf32> to vector<2x32xf32>
    %138 = vector.extract_strided_slice %126 {offsets = [0, 64], sizes = [2, 32], strides = [1, 1]} : vector<2x96xf32> to vector<2x32xf32>
    %139 = vector.extract_strided_slice %127 {offsets = [0, 64], sizes = [2, 32], strides = [1, 1]} : vector<2x96xf32> to vector<2x32xf32>
    %140 = arith.addf %139, %9 : vector<2x32xf32>
    %141 = arith.mulf %136, %140 : vector<2x32xf32>
    %142 = arith.addf %138, %141 : vector<2x32xf32>
    %143 = math.tanh %142 : vector<2x32xf32>
    %cst_28 = arith.constant 1.000000e+00 : f32
    %144 = vector.broadcast %cst_28 : f32 to vector<2x32xf32>
    %145 = arith.subf %144, %137 : vector<2x32xf32>
    %146 = arith.mulf %145, %143 : vector<2x32xf32>
    %147 = arith.mulf %137, %125 : vector<2x32xf32>
    %148 = arith.addf %146, %147 : vector<2x32xf32>
    %149 = vector.extract_strided_slice %5 {offsets = [12, 0], sizes = [2, 96], strides = [1, 1]} : vector<16x96xf32> to vector<2x96xf32>
    %cst_29 = arith.constant dense<0.000000e+00> : vector<2x96xf32>
    %150 = tpu.matmul %148, %6, %cst_29 {dimension_numbers = #tpu.dot_dimension_numbers<[1], [0], [0], [1], [0, 0, 1, 1], [], []>} : vector<2x32xf32>, vector<32x96xf32>, vector<2x96xf32> -> vector<2x96xf32>
    %151 = vector.extract_strided_slice %149 {offsets = [0, 0], sizes = [2, 64], strides = [1, 1]} : vector<2x96xf32> to vector<2x64xf32>
    %152 = vector.extract_strided_slice %150 {offsets = [0, 0], sizes = [2, 64], strides = [1, 1]} : vector<2x96xf32> to vector<2x64xf32>
    %153 = arith.addf %151, %152 : vector<2x64xf32>
    %154 = arith.negf %153 : vector<2x64xf32>
    %155 = math.exp %154 : vector<2x64xf32>
    %cst_30 = arith.constant 1.000000e+00 : f32
    %156 = vector.broadcast %cst_30 : f32 to vector<2x64xf32>
    %157 = arith.addf %156, %155 : vector<2x64xf32>
    %158 = arith.divf %156, %157 : vector<2x64xf32>
    %159 = vector.extract_strided_slice %158 {offsets = [0, 0], sizes = [2, 32], strides = [1, 1]} : vector<2x64xf32> to vector<2x32xf32>
    %160 = vector.extract_strided_slice %158 {offsets = [0, 32], sizes = [2, 32], strides = [1, 1]} : vector<2x64xf32> to vector<2x32xf32>
    %161 = vector.extract_strided_slice %149 {offsets = [0, 64], sizes = [2, 32], strides = [1, 1]} : vector<2x96xf32> to vector<2x32xf32>
    %162 = vector.extract_strided_slice %150 {offsets = [0, 64], sizes = [2, 32], strides = [1, 1]} : vector<2x96xf32> to vector<2x32xf32>
    %163 = arith.addf %162, %9 : vector<2x32xf32>
    %164 = arith.mulf %159, %163 : vector<2x32xf32>
    %165 = arith.addf %161, %164 : vector<2x32xf32>
    %166 = math.tanh %165 : vector<2x32xf32>
    %cst_31 = arith.constant 1.000000e+00 : f32
    %167 = vector.broadcast %cst_31 : f32 to vector<2x32xf32>
    %168 = arith.subf %167, %160 : vector<2x32xf32>
    %169 = arith.mulf %168, %166 : vector<2x32xf32>
    %170 = arith.mulf %160, %148 : vector<2x32xf32>
    %171 = arith.addf %169, %170 : vector<2x32xf32>
    %172 = vector.extract_strided_slice %5 {offsets = [14, 0], sizes = [2, 96], strides = [1, 1]} : vector<16x96xf32> to vector<2x96xf32>
    %cst_32 = arith.constant dense<0.000000e+00> : vector<2x96xf32>
    %173 = tpu.matmul %171, %6, %cst_32 {dimension_numbers = #tpu.dot_dimension_numbers<[1], [0], [0], [1], [0, 0, 1, 1], [], []>} : vector<2x32xf32>, vector<32x96xf32>, vector<2x96xf32> -> vector<2x96xf32>
    %174 = vector.extract_strided_slice %172 {offsets = [0, 0], sizes = [2, 64], strides = [1, 1]} : vector<2x96xf32> to vector<2x64xf32>
    %175 = vector.extract_strided_slice %173 {offsets = [0, 0], sizes = [2, 64], strides = [1, 1]} : vector<2x96xf32> to vector<2x64xf32>
    %176 = arith.addf %174, %175 : vector<2x64xf32>
    %177 = arith.negf %176 : vector<2x64xf32>
    %178 = math.exp %177 : vector<2x64xf32>
    %cst_33 = arith.constant 1.000000e+00 : f32
    %179 = vector.broadcast %cst_33 : f32 to vector<2x64xf32>
    %180 = arith.addf %179, %178 : vector<2x64xf32>
    %181 = arith.divf %179, %180 : vector<2x64xf32>
    %182 = vector.extract_strided_slice %181 {offsets = [0, 0], sizes = [2, 32], strides = [1, 1]} : vector<2x64xf32> to vector<2x32xf32>
    %183 = vector.extract_strided_slice %181 {offsets = [0, 32], sizes = [2, 32], strides = [1, 1]} : vector<2x64xf32> to vector<2x32xf32>
    %184 = vector.extract_strided_slice %172 {offsets = [0, 64], sizes = [2, 32], strides = [1, 1]} : vector<2x96xf32> to vector<2x32xf32>
    %185 = vector.extract_strided_slice %173 {offsets = [0, 64], sizes = [2, 32], strides = [1, 1]} : vector<2x96xf32> to vector<2x32xf32>
    %186 = arith.addf %185, %9 : vector<2x32xf32>
    %187 = arith.mulf %182, %186 : vector<2x32xf32>
    %188 = arith.addf %184, %187 : vector<2x32xf32>
    %189 = math.tanh %188 : vector<2x32xf32>
    %cst_34 = arith.constant 1.000000e+00 : f32
    %190 = vector.broadcast %cst_34 : f32 to vector<2x32xf32>
    %191 = arith.subf %190, %183 : vector<2x32xf32>
    %192 = arith.mulf %191, %189 : vector<2x32xf32>
    %193 = arith.mulf %183, %171 : vector<2x32xf32>
    %194 = arith.addf %192, %193 : vector<2x32xf32>
    %c0_35 = arith.constant 0 : index
    %c0_36 = arith.constant 0 : index
    %195 = vector.load %arg9[%c0_35, %c0_36] : memref<2x32xf32, #tpu.memory_space<vmem>>, vector<2x32xf32>
    tpu.vector_store %arg9[%c0_35, %c0_36], %194 {strides = array<i32>} : memref<2x32xf32, #tpu.memory_space<vmem>>, vector<2x32xf32>,
    %196 = tpu.concatenate %33, %56, %79, %102, %125, %148, %171, %194 in 0 : vector<2x32xf32>, vector<2x32xf32>, vector<2x32xf32>, vector<2x32xf32>, vector<2x32xf32>, vector<2x32xf32>, vector<2x32xf32>, vector<2x32xf32> -> vector<16x32xf32>
    %c0_37 = arith.constant 0 : index
    %c0_38 = arith.constant 0 : index
    %197 = vector.load %arg6[%c0_37, %c0_38] : memref<32x128xf32, #tpu.memory_space<vmem>>, vector<32x128xf32>
    %cst_39 = arith.constant dense<0.000000e+00> : vector<16x128xf32>
    %198 = tpu.matmul %196, %197, %cst_39 {dimension_numbers = #tpu.dot_dimension_numbers<[1], [0], [0], [1], [0, 0, 1, 1], [], []>} : vector<16x32xf32>, vector<32x128xf32>, vector<16x128xf32> -> vector<16x128xf32>
    %c0_40 = arith.constant 0 : index
    %c0_41 = arith.constant 0 : index
    %199 = vector.load %arg7[%c0_40, %c0_41] : memref<1x128xf32, #tpu.memory_space<vmem>>, vector<1x128xf32>
    %200 = vector.broadcast %199 : vector<1x128xf32> to vector<16x128xf32>
    %201 = arith.addf %198, %200 : vector<16x128xf32>
    %c0_42 = arith.constant 0 : index
    %c0_43 = arith.constant 0 : index
    %202 = vector.load %arg8[%c0_42, %c0_43] : memref<16x128xf32, #tpu.memory_space<vmem>>, vector<16x128xf32>
    tpu.vector_store %arg8[%c0_42, %c0_43], %201 {strides = array<i32>} : memref<16x128xf32, #tpu.memory_space<vmem>>, vector<16x128xf32>,
    return
  }
}

</mosaic_0001>

<bundles_post_ra>
// kernel: decoder_forward.1
= control target key start
LH: loop header
LB: loop body
LE: loop exit
PB: predicated region body
PF: predicated region fallthrough
CT: control target
= control target key end

     0   :  { %v1459_v3 = vmov 0.0|0.0   ;;  %vm1460_vm0 = vmmov 0   ;;  %v1461_v8 = vmov 0.0   ;;  %vm45_vm1 = vcmask 261120   ;;  %s1736_s0 = inlined_call_operand.vmem [shape: f32[16,32], index: 0, kind: input, shape index: {}]   ;;  %s1737_s1 = inlined_call_operand.vmem [shape: f32[2,32], index: 1, kind: input, shape index: {}]   ;;  %s1738_s2 = inlined_call_operand.vmem [shape: f32[32,96], index: 2, kind: input, shape index: {}]   ;;  %s1739_s3 = inlined_call_operand.vmem [shape: f32[32,96], index: 3, kind: input, shape index: {}]   ;;  %s1740_s4 = inlined_call_operand.vmem [shape: f32[1,96], index: 4, kind: input, shape index: {}]   ;;  %s1741_s5 = inlined_call_operand.vmem [shape: f32[1,32], index: 5, kind: input, shape index: {}]   ;;  %s1742_s6 = inlined_call_operand.vmem [shape: f32[32,128], index: 6, kind: input, shape index: {}]   ;;  %s1743_s7 = inlined_call_operand.vmem [shape: f32[1,128], index: 7, kind: input, shape index: {}]   ;;  %s1744_s8 = inlined_call_operand.vmem [shape: f32[16,128], index: 8, kind: output, shape index: {0}]   ;;  %s1745_s9 = inlined_call_operand.hbm [shape: f32[2,32], index: 9, kind: output, shape index: {1}]  }
   0x1   :  { %v34_v0 = vld [vmem:[%s1738_s2] sm:$0xff]  ;;  %v35_v1 = vld [vmem:[%s1738_s2 + $0x8] sm:$0xff]  ;;  %1324 = vmatprep.subr.bf16.mxu1 %v1459_v3  ;;  %v36_v6 = vld [vmem:[%s1738_s2 + $0x10] sm:$0xff]  ;;  %1225 = vmatprep.mubr.msk.f32.mxu1 %vm1460_vm0, %v1461_v8 }
   0x2   :  { %v127_v2 = vld [vmem:[%s1739_s3] sm:$0xff]  ;;  %v1316_v4 = vpack.c.bf16 %v35_v1, %v34_v0  ;;  %v128_v5 = vld [vmem:[%s1739_s3 + $0x8] sm:$0xff]  ;;  %v37_v7 = vld [vmem:[%s1738_s2 + $0x18] sm:$0xff] }
   0x3   :  { %v1537_v9 = vpack.c.bf16 %v128_v5, %v127_v2  ;;  %v1320_v10 = vpack.c.bf16 %v37_v7, %v36_v6  ;;  %v129_v11 = vld [vmem:[%s1739_s3 + $0x10] sm:$0xff]  ;;  %v130_v12 = vld [vmem:[%s1739_s3 + $0x18] sm:$0xff]  ;;  %v32_v13 = vld [vmem:[%s1736_s0] sm:$0xff] }
   0x4   :  { %1317 = vmatprep.subr.bf16.mxu0 %v1316_v4  ;;  %1214 = vmatprep.mubr.msk.f32.mxu0 %vm45_vm1, %v32_v13  ;;  %v1134_v14 = vld [vmem:[%s1741_s5] ss:$0 sm:$0xff]  ;;  %v1553_v15 = vpack.c.bf16 %v130_v12, %v129_v11 }
   0x5   :  { %1326 = vmatpush3.bf16.msra.mxu1 %v1537_v9  ;;  %1319 = vmatpush3.bf16.msra.mxu0 %v1316_v4 }
   0x6   :  { %15 = vsyncpa [#allocation3], 0  ;;  %1327 = vmatprep.subr.bf16.mxu1 %v1459_v3  ;;  %1321 = vmatprep.subr.bf16.mxu0 %v1320_v10  ;;  %s1462_s3 = smov 64   ;;  %v137_v16 = vld [vmem:[%s1737_s1] sm:$0x3]  ;;  %v33_v17 = vld [vmem:[%s1736_s0 + $0x8] sm:$0xff] }
   0x7   :  { %218 = vrot.lane.b32.xlu0 %v1134_v14, %s1462_s3  ;;  %v1131_v21 = vld [vmem:[%s1740_s4] ss:$0 sm:$0xff]  ;;  %s1463_s10 = smov 32   ;;  %s1464_s4 = smov 96   ;;  %vm1006_vm2 = vcmask 1041408   ;;  %vm1008_vm3 = vcmask 1043456  }
   0x8   :  { %vm1010_vm4 = vcmask 1045504   ;;  %vm1004_vm5 = vcmask 261126  }
   0x9   :  { %1329 = vmatpush3.bf16.msra.mxu1 %v1553_v15  ;;  %1323 = vmatpush3.bf16.msra.mxu0 %v1320_v10 }
   0xa   :  { %1330 = vmatprep.subr.bf16.mxu0 %v1459_v3  ;;  %1336 = vmatprep.subr.bf16.mxu1 %v1459_v3 }
   0xc   :  { %1226 = vmatmul.mubr.msk.f32.vlgmr.msra.gmra.mrb[0].mxu1 %vm45_vm1, %v137_v16  ;;  %1215 = vmatmul.mubr.msk.f32.vlgmr.msra.gmra.mrb[0].mxu0 %vm45_vm1, %v33_v17 }
   0xd   :  { %1332 = vmatpush3.bf16.msra.mxu0 %v1537_v9  ;;  %1236 = vmatprep.mubr.msk.f32.mxu0 %vm1460_vm0, %v1461_v8 }
   0xe   :  { %1333 = vmatprep.subr.bf16.mxu0 %v1459_v3  ;;  %1338 = vmatpush3.bf16.msra.mxu1 %v1537_v9 }
   0xf   :  { %1339 = vmatprep.subr.bf16.mxu1 %v1459_v3  ;;  %1247 = vmatprep.mubr.msk.f32.mxu1 %vm1460_vm0, %v1461_v8 }
  0x11   :  { %1335 = vmatpush3.bf16.msra.mxu0 %v1553_v15 }
  0x12   :  { %1341 = vmatpush3.bf16.msra.mxu1 %v1553_v15  ;;  %1342 = vmatprep.subr.bf16.mxu0 %v1459_v3 }
  0x13   :  { %1348 = vmatprep.subr.bf16.mxu1 %v1459_v3 }
  0x79   :  { %v1580_v18 = vpop.permute.xlu0 %218 }
  0xdf   :  { %v207_v19 = vpop.f32.mrb[0].mxu1  ;;  %v1216_v20 = vpop.f32.mrb[0].mxu0 }
  0xe0   :  { %v221_v22 = vadd.f32 %v1580_v18, %v207_v19  ;;  %v1586_v23 = vadd.f32 %v1216_v20, %v1131_v21  ;;  %v1227_v24 = vpop.f32.mrb[1].mxu1  ;;  %v118_v25 = vpop.f32.mrb[1].mxu0 }
  0xe1   :  { %v1589_v26 = vadd.f32 %v1131_v21, %v118_v25 }
  0xe2   :  { %223 = vrot.lane.b32.xlu0 %v221_v22, %s1462_s3 }
  0xe3   :  { %v211_v27 = vadd.f32 %v207_v19, %v1589_v26 }
  0xe5   :  { %v1136_v28 = vmul.f32 -1.442695, %v211_v27 }
  0xe6   :  { %239 = vrot.lane.b32.xlu0 %v137_v16, %s1463_s10 }
  0xe7   :  { %1387 = vpow2.f32 %v1136_v28 }
  0xf1   :  { %v1388_v29 = vpop.eup %1387 }
  0xf2   :  { %v215_v30 = vadd.f32 1.0, %v1388_v29 }
  0xf4   :  { %1389 = vrcp.f32 %v215_v30 }
  0xfe   :  { %v1390_v31 = vpop.eup %1389 }
  0xff   :  { %v233_v38 = vsub.f32 1.0, %v1390_v31 }
 0x154   :  { %v224_v32 = vpop.permute.xlu0 %223 }
 0x155   :  { %v226_v33 = vmul.f32 %v1390_v31, %v224_v32 }
 0x157   :  { %228 = vrot.lane.b32.xlu1 %v226_v33, %s1462_s3 }
 0x158   :  { %v240_v37 = vpop.permute.xlu0 %239 }
 0x159   :  { %v242_v40 = vmul.f32 %v1390_v31, %v240_v37 }
 0x1c9   :  { %v229_v34 = vpop.permute.xlu1 %228 }
 0x1ca   :  { %v231_v35 = vadd.f32 %v229_v34, %v1589_v26 }
 0x1cc   :  { %1391 = vtanh.f32 %v231_v35 }
 0x1d6   :  { %v1392_v36 = vpop.eup %1391 }
 0x1d7   :  { %235 = vrot.lane.b32.xlu1 %v1392_v36, %s1464_s4 }
 0x249   :  { %v236_v39 = vpop.permute.xlu1 %235 }
 0x24a   :  { %v238_v41 = vmul.f32 %v236_v39, %v233_v38 }
 0x24c   :  { %v1595_v42 = vadd.f32 %v242_v40, %v238_v41 }
 0x24e   :  { %245 = vrot.lane.b32.xlu1 %v1595_v42, %s1464_s4  ;;  %v348_v60 = vrot.slane %v1595_v42, 6 }
 0x2c0   :  { %v246_v43 = vpop.permute.xlu1 %245 }
 0x2c1   :  { %1237 = vmatmul.mubr.msk.f32.vlgmr.msra.gmra.mrb[2].mxu0 %vm45_vm1, %v246_v43 }
 0x2c2   :  { %1344 = vmatpush3.bf16.msra.mxu0 %v1537_v9  ;;  %1258 = vmatprep.mubr.msk.f32.mxu0 %vm1460_vm0, %v1461_v8 }
 0x2c3   :  { %1345 = vmatprep.subr.bf16.mxu0 %v1459_v3 }
 0x2c6   :  { %1347 = vmatpush3.bf16.msra.mxu0 %v1553_v15 }
 0x2c7   :  { %1354 = vmatprep.subr.bf16.mxu0 %v1459_v3 }
 0x394   :  { %v315_v44 = vpop.f32.mrb[2].mxu0 }
 0x395   :  { %v329_v45 = vadd.f32 %v315_v44, %v1580_v18  ;;  %v1238_v46 = vpop.f32.mrb[3].mxu0  ;;  %v320_v48 = vrot.slane %v315_v44, 6 }
 0x397   :  { %v331_v47 = vrot.slane %v329_v45, 6  ;;  %v322_v49 = vadd.f32 %v320_v48, %v1589_v26 }
 0x399   :  { %332 = vrot.lane.b32.xlu0 %v331_v47, %s1462_s3  ;;  %v1138_v50 = vmul.f32 -1.442695, %v322_v49 }
 0x39b   :  { %1393 = vpow2.f32 %v1138_v50 }
 0x3a5   :  { %v1394_v51 = vpop.eup %1393 }
 0x3a6   :  { %v326_v52 = vadd.f32 1.0, %v1394_v51 }
 0x3a8   :  { %1395 = vrcp.f32 %v326_v52 }
 0x3b2   :  { %v1396_v53 = vpop.eup %1395 }
 0x3b3   :  { %v342_v59 = vsub.f32 1.0, %v1396_v53  ;;  %v350_v63 = vmul.f32 %v1396_v53, %v348_v60 }
 0x40b   :  { %v333_v54 = vpop.permute.xlu0 %332 }
 0x40c   :  { %v335_v55 = vmul.f32 %v1396_v53, %v333_v54 }
 0x40e   :  { %337 = vrot.lane.b32.xlu1 %v335_v55, %s1462_s3 }
 0x480   :  { %v338_v56 = vpop.permute.xlu1 %337 }
 0x481   :  { %v340_v57 = vadd.f32 %v338_v56, %v1589_v26 }
 0x483   :  { %1397 = vtanh.f32 %v340_v57 }
 0x48d   :  { %v1398_v58 = vpop.eup %1397 }
 0x48e   :  { %344 = vrot.lane.b32.xlu0 %v1398_v58, %s1464_s4 }
 0x500   :  { %v345_v61 = vpop.permute.xlu0 %344 }
 0x501   :  { %v347_v62 = vmul.f32 %v345_v61, %v342_v59 }
 0x503   :  { %v351_v0 = vadd.f32 %v350_v63, %v347_v62 }
 0x505   :  { %v353_v1 = vrot.slane %v351_v0, 2  ;;  %v457_v25 = vrot.slane %v351_v0, 6  ;;  %v1007_v31 = vsel %vm1006_vm2, %v1595_v42, %v351_v0 }
 0x507   :  { %354 = vrot.lane.b32.xlu1 %v353_v1, %s1464_s4 }
 0x579   :  { %v355_v2 = vpop.permute.xlu1 %354 }
 0x57a   :  { %1248 = vmatmul.mubr.msk.f32.vlgmr.msra.gmra.mrb[2].mxu1 %vm45_vm1, %v355_v2 }
 0x57b   :  { %1350 = vmatpush3.bf16.msra.mxu1 %v1537_v9  ;;  %1269 = vmatprep.mubr.msk.f32.mxu1 %vm1460_vm0, %v1461_v8 }
 0x57c   :  { %1351 = vmatprep.subr.bf16.mxu1 %v1459_v3 }
 0x57f   :  { %1353 = vmatpush3.bf16.msra.mxu1 %v1553_v15 }
 0x580   :  { %1360 = vmatprep.subr.bf16.mxu1 %v1459_v3 }
 0x64d   :  { %v424_v4 = vpop.f32.mrb[2].mxu1 }
 0x64e   :  { %v438_v5 = vadd.f32 %v424_v4, %v1580_v18  ;;  %v1249_v6 = vpop.f32.mrb[3].mxu1  ;;  %v429_v10 = vrot.slane %v424_v4, 4 }
 0x650   :  { %v440_v7 = vrot.slane %v438_v5, 4  ;;  %v431_v11 = vadd.f32 %v429_v10, %v1589_v26 }
 0x652   :  { %441 = vrot.lane.b32.xlu0 %v440_v7, %s1462_s3  ;;  %v1140_v12 = vmul.f32 -1.442695, %v431_v11 }
 0x654   :  { %1399 = vpow2.f32 %v1140_v12 }
 0x65e   :  { %v1400_v13 = vpop.eup %1399 }
 0x65f   :  { %v435_v14 = vadd.f32 1.0, %v1400_v13 }
 0x661   :  { %1401 = vrcp.f32 %v435_v14 }
 0x66b   :  { %v1402_v16 = vpop.eup %1401 }
 0x66c   :  { %v451_v24 = vsub.f32 1.0, %v1402_v16  ;;  %v459_v28 = vmul.f32 %v1402_v16, %v457_v25 }
 0x6c4   :  { %v442_v17 = vpop.permute.xlu0 %441 }
 0x6c5   :  { %v444_v19 = vmul.f32 %v1402_v16, %v442_v17 }
 0x6c7   :  { %446 = vrot.lane.b32.xlu1 %v444_v19, %s1462_s3 }
 0x739   :  { %v447_v20 = vpop.permute.xlu1 %446 }
 0x73a   :  { %v449_v21 = vadd.f32 %v447_v20, %v1589_v26 }
 0x73c   :  { %1403 = vtanh.f32 %v449_v21 }
 0x746   :  { %v1404_v22 = vpop.eup %1403 }
 0x747   :  { %453 = vrot.lane.b32.xlu0 %v1404_v22, %s1464_s4 }
 0x7b9   :  { %v454_v27 = vpop.permute.xlu0 %453 }
 0x7ba   :  { %v456_v29 = vmul.f32 %v454_v27, %v451_v24 }
 0x7bc   :  { %v460_v30 = vadd.f32 %v459_v28, %v456_v29 }
 0x7be   :  { %v462_v32 = vrot.slane %v460_v30, 4  ;;  %v1009_v33 = vsel %vm1008_vm3, %v1007_v31, %v460_v30  ;;  %v566_v51 = vrot.slane %v460_v30, 6 }
 0x7c0   :  { %463 = vrot.lane.b32.xlu1 %v462_v32, %s1464_s4 }
 0x832   :  { %v464_v34 = vpop.permute.xlu1 %463 }
 0x833   :  { %1259 = vmatmul.mubr.msk.f32.vlgmr.msra.gmra.mrb[4].mxu0 %vm45_vm1, %v464_v34 }
 0x834   :  { %1356 = vmatpush3.bf16.msra.mxu0 %v1537_v9  ;;  %1280 = vmatprep.mubr.msk.f32.mxu0 %vm1460_vm0, %v1461_v8 }
 0x835   :  { %1357 = vmatprep.subr.bf16.mxu0 %v1459_v3 }
 0x838   :  { %1359 = vmatpush3.bf16.msra.mxu0 %v1553_v15 }
 0x839   :  { %1366 = vmatprep.subr.bf16.mxu0 %v1459_v3 }
 0x906   :  { %v533_v35 = vpop.f32.mrb[4].mxu0 }
 0x907   :  { %v547_v36 = vadd.f32 %v533_v35, %v1580_v18  ;;  %v1260_v37 = vpop.f32.mrb[5].mxu0  ;;  %v538_v39 = vrot.slane %v533_v35, 2 }
 0x909   :  { %v549_v38 = vrot.slane %v547_v36, 2  ;;  %v540_v40 = vadd.f32 %v538_v39, %v1589_v26 }
 0x90b   :  { %550 = vrot.lane.b32.xlu0 %v549_v38, %s1462_s3  ;;  %v1142_v41 = vmul.f32 -1.442695, %v540_v40 }
 0x90d   :  { %1405 = vpow2.f32 %v1142_v41 }
 0x917   :  { %v1406_v42 = vpop.eup %1405 }
 0x918   :  { %v544_v43 = vadd.f32 1.0, %v1406_v42 }
 0x91a   :  { %1407 = vrcp.f32 %v544_v43 }
 0x924   :  { %v1408_v44 = vpop.eup %1407 }
 0x925   :  { %v560_v50 = vsub.f32 1.0, %v1408_v44  ;;  %v568_v53 = vmul.f32 %v1408_v44, %v566_v51 }
 0x97d   :  { %v551_v45 = vpop.permute.xlu0 %550 }
 0x97e   :  { %v553_v46 = vmul.f32 %v1408_v44, %v551_v45 }
 0x980   :  { %555 = vrot.lane.b32.xlu1 %v553_v46, %s1462_s3 }
 0x9f2   :  { %v556_v47 = vpop.permute.xlu1 %555 }
 0x9f3   :  { %v558_v48 = vadd.f32 %v556_v47, %v1589_v26 }
 0x9f5   :  { %1409 = vtanh.f32 %v558_v48 }
 0x9ff   :  { %v1410_v49 = vpop.eup %1409 }
 0xa00   :  { %562 = vrot.lane.b32.xlu0 %v1410_v49, %s1464_s4 }
 0xa72   :  { %v563_v52 = vpop.permute.xlu0 %562 }
 0xa73   :  { %v565_v54 = vmul.f32 %v563_v52, %v560_v50 }
 0xa75   :  { %v569_v55 = vadd.f32 %v568_v53, %v565_v54 }
 0xa77   :  { %v571_v56 = vrot.slane %v569_v55, 6  ;;  %v1645_v57 = vsel %vm1010_vm4, %v1009_v33, %v569_v55 }
 0xa79   :  { %572 = vrot.lane.b32.xlu1 %v571_v56, %s1464_s4 }
 0xaeb   :  { %v573_v58 = vpop.permute.xlu1 %572 }
 0xaec   :  { %1270 = vmatmul.mubr.msk.f32.vlgmr.msra.gmra.mrb[4].mxu1 %vm45_vm1, %v573_v58 }
 0xaed   :  { %1362 = vmatpush3.bf16.msra.mxu1 %v1537_v9  ;;  %1291 = vmatprep.mubr.msk.f32.mxu1 %vm1460_vm0, %v1461_v8 }
 0xaee   :  { %1363 = vmatprep.subr.bf16.mxu1 %v1459_v3 }
 0xaf1   :  { %1365 = vmatpush3.bf16.msra.mxu1 %v1553_v15 }
 0xbbf   :  { %v642_v26 = vpop.f32.mrb[4].mxu1 }
 0xbc0   :  { %v653_v59 = vadd.f32 %v642_v26, %v1580_v18  ;;  %v1271_v60 = vpop.f32.mrb[5].mxu1  ;;  %v646_v61 = vadd.f32 %v642_v26, %v1586_v23 }
 0xbc2   :  { %655 = vrot.lane.b32.xlu0 %v653_v59, %s1462_s3  ;;  %v1144_v62 = vmul.f32 -1.442695, %v646_v61 }
 0xbc4   :  { %1411 = vpow2.f32 %v1144_v62 }
 0xbce   :  { %v1412_v63 = vpop.eup %1411 }
 0xbcf   :  { %v650_v0 = vadd.f32 1.0, %v1412_v63 }
 0xbd1   :  { %1413 = vrcp.f32 %v650_v0 }
 0xbdb   :  { %v1414_v1 = vpop.eup %1413 }
 0xbdc   :  { %v665_v10 = vsub.f32 1.0, %v1414_v1  ;;  %v672_v12 = vmul.f32 %v1414_v1, %v571_v56 }
 0xc34   :  { %v656_v2 = vpop.permute.xlu0 %655 }
 0xc35   :  { %v658_v4 = vmul.f32 %v1414_v1, %v656_v2 }
 0xc37   :  { %660 = vrot.lane.b32.xlu1 %v658_v4, %s1462_s3 }
 0xca9   :  { %v661_v5 = vpop.permute.xlu1 %660 }
 0xcaa   :  { %v663_v6 = vadd.f32 %v661_v5, %v1586_v23 }
 0xcac   :  { %1415 = vtanh.f32 %v663_v6 }
 0xcb6   :  { %v1416_v7 = vpop.eup %1415 }
 0xcb7   :  { %667 = vrot.lane.b32.xlu0 %v1416_v7, %s1464_s4 }
 0xd29   :  { %v668_v11 = vpop.permute.xlu0 %667 }
 0xd2a   :  { %v670_v13 = vmul.f32 %v668_v11, %v665_v10 }
 0xd2c   :  { %v1660_v14 = vadd.f32 %v672_v12, %v670_v13 }
 0xd2e   :  { %675 = vrot.lane.b32.xlu1 %v1660_v14, %s1464_s4  ;;  %v778_v32 = vrot.slane %v1660_v14, 6 }
 0xda0   :  { %v676_v16 = vpop.permute.xlu1 %675 }
 0xda1   :  { %1281 = vmatmul.mubr.msk.f32.vlgmr.msra.gmra.mrb[6].mxu0 %vm45_vm1, %v676_v16 }
 0xda2   :  { %1368 = vmatpush3.bf16.msra.mxu0 %v1537_v9  ;;  %1302 = vmatprep.mubr.msk.f32.mxu0 %vm1460_vm0, %v1461_v8 }
 0xda3   :  { %1369 = vmatprep.subr.bf16.mxu0 %v1459_v3 }
 0xda6   :  { %1371 = vmatpush3.bf16.msra.mxu0 %v1553_v15 }
 0xe74   :  { %v745_v17 = vpop.f32.mrb[6].mxu0 }
 0xe75   :  { %v759_v19 = vadd.f32 %v745_v17, %v1580_v18  ;;  %v1282_v20 = vpop.f32.mrb[7].mxu0  ;;  %v750_v22 = vrot.slane %v745_v17, 6 }
 0xe76   :  { %v1016_v20 = vld [vmem:[%s1742_s6 + $0x8] sm:$0xff] }
 0xe77   :  { %v761_v21 = vrot.slane %v759_v19, 6  ;;  %v752_v24 = vadd.f32 %v750_v22, %v1586_v23  ;;  %v1015_v19 = vld [vmem:[%s1742_s6] sm:$0xff] }
 0xe79   :  { %762 = vrot.lane.b32.xlu0 %v761_v21, %s1462_s3  ;;  %v1146_v25 = vmul.f32 -1.442695, %v752_v24  ;;  %v1017_v21 = vld [vmem:[%s1742_s6 + $0x10] sm:$0xff] }
 0xe7b   :  { %1417 = vpow2.f32 %v1146_v25 }
 0xe85   :  { %v1418_v9 = vpop.eup %1417 }
 0xe86   :  { %v756_v27 = vadd.f32 1.0, %v1418_v9 }
 0xe88   :  { %1419 = vrcp.f32 %v756_v27 }
 0xe92   :  { %v1420_v8 = vpop.eup %1419 }
 0xe93   :  { %v772_v31 = vsub.f32 1.0, %v1420_v8  ;;  %v780_v35 = vmul.f32 %v1420_v8, %v778_v32 }
 0xeeb   :  { %v763_v28 = vpop.permute.xlu0 %762 }
 0xeec   :  { %v765_v3 = vmul.f32 %v1420_v8, %v763_v28 }
 0xeee   :  { %767 = vrot.lane.b32.xlu1 %v765_v3, %s1462_s3 }
 0xf60   :  { %v768_v15 = vpop.permute.xlu1 %767 }
 0xf61   :  { %v770_v29 = vadd.f32 %v768_v15, %v1586_v23 }
 0xf63   :  { %1421 = vtanh.f32 %v770_v29 }
 0xf6d   :  { %v1422_v30 = vpop.eup %1421 }
 0xf6e   :  { %774 = vrot.lane.b32.xlu0 %v1422_v30, %s1464_s4 }
 0xfe0   :  { %v775_v33 = vpop.permute.xlu0 %774 }
 0xfe1   :  { %v777_v34 = vmul.f32 %v775_v33, %v772_v31 }
 0xfe3   :  { %v781_v36 = vadd.f32 %v780_v35, %v777_v34 }
 0xfe5   :  { %v783_v37 = vrot.slane %v781_v36, 2  ;;  %v887_v55 = vrot.slane %v781_v36, 6  ;;  %v1012_v60 = vsel %vm1006_vm2, %v1660_v14, %v781_v36 }
 0xfe7   :  { %784 = vrot.lane.b32.xlu1 %v783_v37, %s1464_s4 }
0x1059   :  { %v785_v38 = vpop.permute.xlu1 %784 }
0x105a   :  { %1292 = vmatmul.mubr.msk.f32.vlgmr.msra.gmra.mrb[6].mxu1 %vm45_vm1, %v785_v38 }
0x112d   :  { %v854_v39 = vpop.f32.mrb[6].mxu1 }
0x112e   :  { %v868_v40 = vadd.f32 %v854_v39, %v1580_v18  ;;  %v1293_v41 = vpop.f32.mrb[7].mxu1  ;;  %v859_v43 = vrot.slane %v854_v39, 4 }
0x1130   :  { %v870_v42 = vrot.slane %v868_v40, 4  ;;  %v861_v44 = vadd.f32 %v859_v43, %v1586_v23 }
0x1132   :  { %871 = vrot.lane.b32.xlu0 %v870_v42, %s1462_s3  ;;  %v1148_v45 = vmul.f32 -1.442695, %v861_v44 }
0x1134   :  { %1423 = vpow2.f32 %v1148_v45 }
0x113e   :  { %v1424_v46 = vpop.eup %1423 }
0x113f   :  { %v865_v47 = vadd.f32 1.0, %v1424_v46 }
0x1141   :  { %1425 = vrcp.f32 %v865_v47 }
0x114b   :  { %v1426_v48 = vpop.eup %1425 }
0x114c   :  { %v881_v54 = vsub.f32 1.0, %v1426_v48  ;;  %v889_v58 = vmul.f32 %v1426_v48, %v887_v55 }
0x11a4   :  { %v872_v49 = vpop.permute.xlu0 %871 }
0x11a5   :  { %v874_v50 = vmul.f32 %v1426_v48, %v872_v49 }
0x11a7   :  { %876 = vrot.lane.b32.xlu1 %v874_v50, %s1462_s3 }
0x1219   :  { %v877_v51 = vpop.permute.xlu1 %876 }
0x121a   :  { %v879_v52 = vadd.f32 %v877_v51, %v1586_v23 }
0x121c   :  { %1427 = vtanh.f32 %v879_v52 }
0x1226   :  { %v1428_v53 = vpop.eup %1427 }
0x1227   :  { %883 = vrot.lane.b32.xlu0 %v1428_v53, %s1464_s4 }
0x1299   :  { %v884_v56 = vpop.permute.xlu0 %883 }
0x129a   :  { %v886_v26 = vmul.f32 %v884_v56, %v881_v54 }
0x129c   :  { %v890_v59 = vadd.f32 %v889_v58, %v886_v26 }
0x129e   :  { %v892_v61 = vrot.slane %v890_v59, 4  ;;  %v1013_v62 = vsel %vm1008_vm3, %v1012_v60, %v890_v59  ;;  %v996_v9 = vrot.slane %v890_v59, 6 }
0x12a0   :  { %893 = vrot.lane.b32.xlu1 %v892_v61, %s1464_s4 }
0x1312   :  { %v894_v63 = vpop.permute.xlu1 %893 }
0x1313   :  { %1303 = vmatmul.mubr.msk.f32.vlgmr.msra.gmra.mrb[8].mxu0 %vm45_vm1, %v894_v63 }
0x13e6   :  { %v963_v0 = vpop.f32.mrb[8].mxu0 }
0x13e7   :  { %v977_v1 = vadd.f32 %v963_v0, %v1580_v18  ;;  %v1304_v2 = vpop.f32.mrb[9].mxu0  ;;  %v968_v5 = vrot.slane %v963_v0, 2 }
0x13e9   :  { %v979_v4 = vrot.slane %v977_v1, 2  ;;  %v970_v6 = vadd.f32 %v968_v5, %v1586_v23 }
0x13eb   :  { %980 = vrot.lane.b32.xlu0 %v979_v4, %s1462_s3  ;;  %v1150_v7 = vmul.f32 -1.442695, %v970_v6 }
0x13ed   :  { %1429 = vpow2.f32 %v1150_v7 }
0x13f7   :  { %v1430_v10 = vpop.eup %1429 }
0x13f8   :  { %v974_v11 = vadd.f32 1.0, %v1430_v10 }
0x13fa   :  { %1431 = vrcp.f32 %v974_v11 }
0x1404   :  { %v1432_v12 = vpop.eup %1431 }
0x1405   :  { %v990_v25 = vsub.f32 1.0, %v1432_v12  ;;  %v998_v8 = vmul.f32 %v1432_v12, %v996_v9 }
0x145d   :  { %v981_v13 = vpop.permute.xlu0 %980 }
0x145e   :  { %v983_v14 = vmul.f32 %v1432_v12, %v981_v13 }
0x1460   :  { %985 = vrot.lane.b32.xlu1 %v983_v14, %s1462_s3 }
0x1464   :  { %1028 = vrot.lane.b32.xlu1 %v1645_v57, %s1464_s4  ;;  %v1372_v57 = vpack.c.bf16 %v1016_v20, %v1015_v19 }
0x1466   :  { %1373 = vmatprep.subr.bf16.mxu1 %v1372_v57 }
0x1467   :  { %1375 = vmatpush3.bf16.msra.mxu1 %v1372_v57 }
0x14d2   :  { %v986_v18 = vpop.permute.xlu1 %985 }
0x14d3   :  { %v988_v16 = vadd.f32 %v986_v18, %v1586_v23  ;;  %v1018_v23 = vld [vmem:[%s1742_s6 + $0x18] sm:$0xff]  ;;  %s1465_s6 = smov [#allocation2]  }
0x14d4   :  { %v1376_v22 = vpack.c.bf16 %v1018_v23, %v1017_v21  ;;  %s1121_s19 = sshll.u32 %s1465_s6, 4  ;;  %s1122_s19 = int_to_ptr.vmem [resolvable:$true] %s1121_s19 }
0x14d5   :  { %1433 = vtanh.f32 %v988_v16  ;;  %s1435_s20 = scalar_lea.vmem %s1122_s19, 32  ;;  %p1440_p1 = scmp.lt.s32.totalorder %s1122_s19, %s1122_s19 }
0x14d6   :  { %v1029_v17 = vpop.permute.xlu1 %1028  ;;  %1377 = vmatprep.subr.bf16.mxu1 %v1376_v22  ;;  %p1436_p0 = scmp.ne.s32.totalorder %s1122_s19, %s1435_s20  ;;  %p1441_p2 = scmp.lt.s32.totalorder %s1435_s20, %s1435_s20 }
0x14d7   :  { %1313 = vmatprep.mubr.msk.f32.mxu1 %vm45_vm1, %v1029_v17  ;;  %1379 = vmatpush3.bf16.msra.mxu1 %v1376_v22 }
0x14d8   :  { %p1442_p3 = por %p1441_p2, %p1440_p1 }
0x14da   :  { %p1443_p4 = pnand %p1442_p3, %p1436_p0 }
0x14df   :  { %v1434_v24 = vpop.eup %1433 }
0x14e0   :  { %992 = vrot.lane.b32.xlu0 %v1434_v24, %s1464_s4 }
0x1552   :  { %v993_v27 = vpop.permute.xlu0 %992 }
0x1553   :  { %v995_v28 = vmul.f32 %v993_v27, %v990_v25 }
0x1555   :  { %v999_v3 = vadd.f32 %v998_v8, %v995_v28 }
0x1557   :  { %1001 = vrot.lane.b32.xlu1 %v999_v3, %s1464_s4  ;;  %v1014_v15 = vsel %vm1010_vm4, %v1013_v62, %v999_v3 }
0x1558   :  { %1030 = vrot.lane.b32.xlu0 %v1014_v15, %s1464_s4 }
0x15c9   :  { %v1002_v29 = vpop.permute.xlu1 %1001 }
0x15ca   :  { %1005 = vst.msk [vmem:[#allocation2 - $0x6] sm:$0xc0] %vm1004_vm5, %v1002_v29  ;;  %v1031_v30 = vpop.permute.xlu0 %1030 }
0x15cb   :  { %1314 = vmatmul.mubr.msk.f32.vlgmr.msra.gmra.mrb[8].mxu1 %vm45_vm1, %v1031_v30 }
0x15cc   :  { %1446 = shalt.err (!%p1443_p4)
}
0x15cd   :  { %s1447_s23 = scalar_lea.hbm %s1745_s9, 32 }
0x15ce   :  { %p1448_p5 = scmp.ne.s32.totalorder %s1745_s9, %s1447_s23  ;;  %p1451_p6 = scmp.lt.u32.totalorder %s1447_s23, %s1745_s9 }
0x15d0   :  { %p1453_p7 = pnand %p1451_p6, %p1448_p5 }
0x15d2   :  { %1456 = shalt.err (!%p1453_p7)
}
0x15d3   :  { %1124 = dma.vmem_to_hbm [thread:$0]  %s1122_s19, 32, %s1745_s9, [#allocation3]   ;;  %v1151_v31 = vld [vmem:[%s1743_s7] ss:$0 sm:$0xff] }
0x169e   :  { %v1315_v32 = vpop.f32.mrb[8].mxu1 }
0x169f   :  { %v1108_v33 = vadd.f32 %v1315_v32, %v1151_v31  ;;  %v1102_v34 = vpop.f32.mrb[9].mxu1 }
0x16a0   :  { %v1103_v35 = vadd.f32 %v1151_v31, %v1102_v34 }
0x16a1   :  { %1112 = vst [vmem:[%s1744_s8 + $0x8] sm:$0xff] %v1108_v33 }
0x16a2   :  { %1111 = vst [vmem:[%s1744_s8] sm:$0xff] %v1103_v35 }
0x16a3   :  { %1457 = dma.done.wait [#allocation3], 32  }
0x16a4   :  { %1458 = vsyncadd [#allocation3], 4294967264 }
0x16a5   :  { %1130 = vsyncpa [#allocation3], 1 }

</bundles_post_ra>
